<compile_context>
chip_gen: v7x
topology: tpu7x:2x2x1
jax: 0.10.0
libtpu: 0.0.40
codegen_flags: <defaults>
</compile_context>

<pallas_src>
import jax
import jax.numpy as jnp
from jax import lax
from jax.experimental import pallas as pl
from jax.experimental.pallas import tpu as pltpu


# ----------------------------- Pallas kernel ------------------------------- #
def _ce_embedding_kernel(cont_ref, cat_ref, w_ref, out_ref):
    """Single step over the whole batch.

    cont_ref: (B*S, 7)  f32  [cont_p(3) | cont_c(2) | ones (b1 fold) | pool w]
    cat_ref : (B*S, 8)  i32  7 offset-shifted categorical indices + bias-slot
    w_ref   : (K+6, K)  f32  rows [0,K): fused GEMM RHS (cat tables, w2, b2)
                             rows [K,K+6): fused layer-1 (b1 folded); hidden
                             output lanes placed at [K-2E, K)
    out_ref : (B, K)    f32  lane-dense; real output in lanes [0, 4E)
    """
    f32 = jnp.float32
    hi = lax.Precision.HIGHEST

    R, C = cont_ref.shape
    n_cat = cat_ref.shape[1]
    K = w_ref.shape[1]
    B = out_ref.shape[0]
    S = R // B

    cont = cont_ref[:, 0:C - 1]                       # (R, 6)
    wcol = cont_ref[:, C - 1:C]                       # (R, 1) masked-mean weights

    # --- continuous layer-1 + ELU; hidden lands on lanes [K-2E, K), rest exactly 0 ---
    h = jnp.dot(cont, w_ref[K:, :], precision=hi,
                preferred_element_type=f32)           # (R, K)
    h = jnp.where(h > 0.0, h, jnp.exp(h) - 1.0)       # ELU(alpha=1); zero lanes stay 0

    # --- weighted rows = wcol*h + wcol-valued multi-hot over the stacked vocab ---
    wcol_b = jnp.broadcast_to(wcol, (R, K))           # hoisted: one broadcast total
    rows = wcol_b * h
    iota = lax.broadcasted_iota(jnp.int32, (R, K), 1)
    idx = cat_ref[...]
    for j in range(n_cat):                            # 8 static compare+select+add (VPU)
        rows = rows + jnp.where(idx[:, j:j + 1] == iota, wcol_b, 0.0)

    # --- per-batch pooling (segment sum over S), then one (B,K)@(K,K) GEMM ---
    pooled = jnp.sum(rows.reshape(B, S, K), axis=1)   # (B, K)
    out_ref[...] = jnp.dot(pooled, w_ref[0:K, :], precision=hi,
                           preferred_element_type=f32)


# ------------------------------- wrapper ----------------------------------- #
def ce_embedding_forward(params, cont_p, cont_c, cat_p, cat_c, val_len, diff_days):
    # disable_pe=True -> diff_days / positional embedding are unused.
    B, S, _ = cont_p.shape
    E = params["lookup_gender"].shape[1]
    TWO_E, FOUR_E = 2 * E, 4 * E

    vocabs = [2, 2, 2, 11, 34, 19, 31]
    offsets, acc = [], 0
    for v in vocabs:
        offsets.append(acc)
        acc += v
    V_TOTAL = acc                                   # 101
    n_p_rows = sum(vocabs[:5])                      # 51

    # fused-GEMM contraction width: stacked vocab + bias slot + 2E hidden lanes,
    # rounded up to a lane-dense multiple of 128 (K = 128 for E = 8).
    K = ((V_TOTAL + 1 + TWO_E + 127) // 128) * 128
    V_PAD = K - TWO_E                               # hidden lanes live at [V_PAD, K)
    BIAS_ROW = V_TOTAL                              # unused vocab-pad row -> layer-2 bias
    C1 = 3 + 2 + 1                                  # cont_p + cont_c + ones column

    # ---- single packed weight buffer: rows [0,K) = GEMM RHS, rows [K,K+C1) = layer-1 ----
    tab_p = jnp.concatenate([params["lookup_gender"], params["lookup_korean"],
                             params["lookup_primary"], params["lookup_job"],
                             params["lookup_rep"]], axis=0) * (1.0 / 5.0)      # (51, E)
    tab_c = jnp.concatenate([params["lookup_place"], params["lookup_add"]],
                            axis=0) * (1.0 / 2.0)                              # (50, E)
    b1f = jnp.concatenate([params["bp1"], params["bc1"]], axis=1)              # (1, 2E)
    b2f = jnp.concatenate([params["bp2"], params["bc2"]], axis=1)              # (1, 2E)

    w_all = jnp.zeros((K + C1, K), jnp.float32)
    w_all = w_all.at[:n_p_rows, 0:E].set(tab_p)                    # cat_p mean -> out[:, 0:E]
    w_all = w_all.at[n_p_rows:V_TOTAL, E:TWO_E].set(tab_c)         # cat_c mean -> out[:, E:2E]
    w_all = w_all.at[BIAS_ROW, TWO_E:FOUR_E].set(b2f[0])           # pooled layer-2 bias
    w_all = w_all.at[V_PAD:V_PAD + E, TWO_E:3 * E].set(params["wp2"])
    w_all = w_all.at[V_PAD + E:K, 3 * E:FOUR_E].set(params["wc2"])
    # layer-1 (bias folded via the ones column); hidden output at lanes [V_PAD, K)
    w_all = w_all.at[K:K + 3, V_PAD:V_PAD + E].set(params["wp1"])
    w_all = w_all.at[K + 3:K + 5, V_PAD + E:K].set(params["wc1"])
    w_all = w_all.at[K + 5, V_PAD:K].set(b1f[0])

    # ---- categorical indices: 7 offset-shifted features + constant bias slot ----
    off_p = jnp.asarray(offsets[:5], jnp.int32)
    off_c = jnp.asarray(offsets[5:], jnp.int32)
    cat_idx = jnp.concatenate(
        [cat_p.astype(jnp.int32) + off_p,
         cat_c.astype(jnp.int32) + off_c,
         jnp.full((B, S, 1), BIAS_ROW, jnp.int32)], axis=-1).reshape(B * S, 8)

    # ---- cont features + ones (layer-1 bias) + masked-mean pooling weight ----
    # TODO(synk): reduction_cluster() is not defined in the reference source;
    # 'mean' is implemented as a masked mean over the first val_len steps.
    mask = (jnp.arange(S)[None, :] < val_len[:, None]).astype(jnp.float32)
    wcol = mask / jnp.maximum(val_len[:, None].astype(jnp.float32), 1.0)       # (B, S)
    cont_all = jnp.concatenate(
        [cont_p.astype(jnp.float32), cont_c.astype(jnp.float32),
         jnp.ones((B, S, 1), jnp.float32), wcol[:, :, None]],
        axis=-1).reshape(B * S, C1 + 1)

    # Single whole-batch step: B*S=16 rows, few-KB working set -> no grid needed.
    # TODO(synk): re-introduce a batched grid once B*S exceeds a few thousand rows.
    out = pl.pallas_call(
        _ce_embedding_kernel,
        out_shape=jax.ShapeDtypeStruct((B, K), jnp.float32),
        in_specs=[pl.BlockSpec(memory_space=pltpu.MemorySpace.VMEM)] * 3,
        out_specs=pl.BlockSpec(memory_space=pltpu.MemorySpace.VMEM),
    )(cont_all, cat_idx, w_all)
    return out[:, :FOUR_E]


# -------------------------- pure-JAX reference ------------------------------ #
def ce_embedding_reference(params, cont_p, cont_c, cat_p, cat_c, val_len, diff_days):
    elu = lambda x: jnp.where(x > 0.0, x, jnp.exp(x) - 1.0)
    cat_p_emb = jnp.mean(jnp.stack([
        params["lookup_gender"][cat_p[:, :, 0]],
        params["lookup_korean"][cat_p[:, :, 1]],
        params["lookup_primary"][cat_p[:, :, 2]],
        params["lookup_job"][cat_p[:, :, 3]],
        params["lookup_rep"][cat_p[:, :, 4]],
    ]), axis=0)
    cat_c_emb = jnp.mean(jnp.stack([
        params["lookup_place"][cat_c[:, :, 0]],
        params["lookup_add"][cat_c[:, :, 1]],
    ]), axis=0)
    cp = elu(cont_p @ params["wp1"] + params["bp1"]) @ params["wp2"] + params["bp2"]
    cc = elu(cont_c @ params["wc1"] + params["bc1"]) @ params["wc2"] + params["bc2"]
    x = jnp.concatenate([cat_p_emb, cat_c_emb, cp, cc], axis=2)          # (B, S, 4E)

    B, S, _ = cont_p.shape
    mask = (jnp.arange(S)[None, :] < val_len[:, None]).astype(jnp.float32)[:, :, None]
    return jnp.sum(x * mask, axis=1) / jnp.maximum(val_len[:, None].astype(jnp.float32), 1.0)


# ------------------------------ param init ---------------------------------- #
def init_params(key, output_size=32):
    # emb_dim = emb_hidden_dim = nn_dim = output_size // 4
    # single_treatment=True, use_treatment=False -> cont_c_NN input dim = 2
    E = output_size // 4
    ks = jax.random.split(key, 16)

    def lin(k, fan_in, fan_out):
        s = 1.0 / jnp.sqrt(fan_in)
        k1, k2 = jax.random.split(k)
        return (jax.random.uniform(k1, (fan_in, fan_out), jnp.float32, -s, s),
                jax.random.uniform(k2, (1, fan_out), jnp.float32, -s, s))

    p = {}
    p["wp1"], p["bp1"] = lin(ks[0], 3, E)
    p["wp2"], p["bp2"] = lin(ks[1], E, E)
    p["wc1"], p["bc1"] = lin(ks[2], 2, E)
    p["wc2"], p["bc2"] = lin(ks[3], E, E)

    p["lookup_gender"]  = jax.random.normal(ks[4],  (2, E),  jnp.float32)
    p["lookup_korean"]  = jax.random.normal(ks[5],  (2, E),  jnp.float32)
    p["lookup_primary"] = jax.random.normal(ks[6],  (2, E),  jnp.float32)
    p["lookup_job"]     = jax.random.normal(ks[7],  (11, E), jnp.float32)
    p["lookup_rep"]     = jax.random.normal(ks[8],  (34, E), jnp.float32)
    p["lookup_place"]   = jax.random.normal(ks[9],  (19, E), jnp.float32)
    p["lookup_add"]     = jax.random.normal(ks[10], (31, E), jnp.float32)
    return p


# --------------------------------- main ------------------------------------- #
if __name__ == "__main__":
    B, S = 2, 8
    OUTPUT_SIZE = 32          # -> emb_dim = 8, output (B, 32)

    key = jax.random.PRNGKey(0)
    kp, kd = jax.random.split(key)
    params = init_params(kp, OUTPUT_SIZE)

    kds = jax.random.split(kd, 10)
    cont_p = jax.random.normal(kds[0], (B, S, 3), jnp.float32)
    cont_c = jax.random.normal(kds[1], (B, S, 2), jnp.float32)
    cat_p = jnp.stack([
        jax.random.randint(kds[2], (B, S), 0, 2),
        jax.random.randint(kds[3], (B, S), 0, 2),
        jax.random.randint(kds[4], (B, S), 0, 2),
        jax.random.randint(kds[5], (B, S), 0, 11),
        jax.random.randint(kds[6], (B, S), 0, 34),
    ], axis=-1)                                              # (B, S, 5)
    cat_c = jnp.stack([
        jax.random.randint(kds[7], (B, S), 0, 19),
        jax.random.randint(kds[8], (B, S), 0, 31),
    ], axis=-1)                                              # (B, S, 2)
    val_len = jnp.array([5, 8], dtype=jnp.int32)             # (B,)
    diff_days = jnp.zeros((B, S, 1), jnp.float32)            # unused (disable_pe=True)

    out = ce_embedding_forward(params, cont_p, cont_c, cat_p, cat_c, val_len, diff_days)
    out = jax.block_until_ready(out)

    ref = ce_embedding_reference(params, cont_p, cont_c, cat_p, cat_c, val_len, diff_days)
    assert out.shape == (B, OUTPUT_SIZE), out.shape
    assert jnp.allclose(out, ref, atol=1e-4, rtol=1e-4), (out, ref)

    print("KERNEL_OK")
</pallas_src>

<mosaic_0001>
module attributes {stable_mosaic.version = 11 : i64} {
  func.func @_ce_embedding_kernel(%arg0: memref<16x7xf32, #tpu.memory_space<vmem>>, %arg1: memref<16x8xi32, #tpu.memory_space<vmem>>, %arg2: memref<134x128xf32, #tpu.memory_space<vmem>>, %arg3: memref<2x128xf32, #tpu.memory_space<vmem>>) attributes {dimension_semantics = [], scalar_prefetch = 0 : i64, scratch_operands = 0 : i64, tpu.core_type = #tpu.core_type<tc>} {
    %c0 = arith.constant 0 : index
    %c0_0 = arith.constant 0 : index
    %0 = vector.load %arg0[%c0, %c0_0] : memref<16x7xf32, #tpu.memory_space<vmem>>, vector<16x6xf32>
    %c0_1 = arith.constant 0 : index
    %c6 = arith.constant 6 : index
    %1 = vector.load %arg0[%c0_1, %c6] : memref<16x7xf32, #tpu.memory_space<vmem>>, vector<16x1xf32>
    %c128 = arith.constant 128 : index
    %c0_2 = arith.constant 0 : index
    %2 = vector.load %arg2[%c128, %c0_2] : memref<134x128xf32, #tpu.memory_space<vmem>>, vector<6x128xf32>
    %cst = arith.constant dense<0.000000e+00> : vector<16x128xf32>
    %3 = tpu.matmul %0, %2, %cst {dimension_numbers = #tpu.dot_dimension_numbers<[1], [0], [0], [1], [0, 0, 1, 1], [], []>, precision = #tpu.contract_precision<fp32>} : vector<16x6xf32>, vector<6x128xf32>, vector<16x128xf32> -> vector<16x128xf32>
    %cst_3 = arith.constant 0.000000e+00 : f32
    %4 = vector.broadcast %cst_3 : f32 to vector<16x128xf32>
    %5 = arith.cmpf ogt, %3, %4 : vector<16x128xf32>
    %6 = math.exp %3 : vector<16x128xf32>
    %cst_4 = arith.constant 1.000000e+00 : f32
    %7 = vector.broadcast %cst_4 : f32 to vector<16x128xf32>
    %8 = arith.subf %6, %7 : vector<16x128xf32>
    %9 = arith.select %5, %3, %8 : vector<16x128xi1>, vector<16x128xf32>
    %10 = vector.shape_cast %1 : vector<16x1xf32> to vector<16x1xf32>
    %11 = vector.broadcast %10 : vector<16x1xf32> to vector<16x128xf32>
    %12 = arith.mulf %11, %9 : vector<16x128xf32>
    %13 = tpu.iota {dimensions = array<i32: 1>} : vector<16x128xi32>
    %c0_5 = arith.constant 0 : index
    %c0_6 = arith.constant 0 : index
    %14 = vector.load %arg1[%c0_5, %c0_6] : memref<16x8xi32, #tpu.memory_space<vmem>>, vector<16x8xi32>
    %15 = vector.extract_strided_slice %14 {offsets = [0, 0], sizes = [16, 1], strides = [1, 1]} : vector<16x8xi32> to vector<16x1xi32>
    %16 = vector.broadcast %15 : vector<16x1xi32> to vector<16x128xi32>
    %17 = arith.cmpi eq, %16, %13 : vector<16x128xi32>
    %cst_7 = arith.constant 0.000000e+00 : f32
    %18 = vector.broadcast %cst_7 : f32 to vector<16x128xf32>
    %19 = arith.select %17, %11, %18 : vector<16x128xi1>, vector<16x128xf32>
    %20 = arith.addf %12, %19 : vector<16x128xf32>
    %21 = vector.extract_strided_slice %14 {offsets = [0, 1], sizes = [16, 1], strides = [1, 1]} : vector<16x8xi32> to vector<16x1xi32>
    %22 = vector.broadcast %21 : vector<16x1xi32> to vector<16x128xi32>
    %23 = arith.cmpi eq, %22, %13 : vector<16x128xi32>
    %cst_8 = arith.constant 0.000000e+00 : f32
    %24 = vector.broadcast %cst_8 : f32 to vector<16x128xf32>
    %25 = arith.select %23, %11, %24 : vector<16x128xi1>, vector<16x128xf32>
    %26 = arith.addf %20, %25 : vector<16x128xf32>
    %27 = vector.extract_strided_slice %14 {offsets = [0, 2], sizes = [16, 1], strides = [1, 1]} : vector<16x8xi32> to vector<16x1xi32>
    %28 = vector.broadcast %27 : vector<16x1xi32> to vector<16x128xi32>
    %29 = arith.cmpi eq, %28, %13 : vector<16x128xi32>
    %cst_9 = arith.constant 0.000000e+00 : f32
    %30 = vector.broadcast %cst_9 : f32 to vector<16x128xf32>
    %31 = arith.select %29, %11, %30 : vector<16x128xi1>, vector<16x128xf32>
    %32 = arith.addf %26, %31 : vector<16x128xf32>
    %33 = vector.extract_strided_slice %14 {offsets = [0, 3], sizes = [16, 1], strides = [1, 1]} : vector<16x8xi32> to vector<16x1xi32>
    %34 = vector.broadcast %33 : vector<16x1xi32> to vector<16x128xi32>
    %35 = arith.cmpi eq, %34, %13 : vector<16x128xi32>
    %cst_10 = arith.constant 0.000000e+00 : f32
    %36 = vector.broadcast %cst_10 : f32 to vector<16x128xf32>
    %37 = arith.select %35, %11, %36 : vector<16x128xi1>, vector<16x128xf32>
    %38 = arith.addf %32, %37 : vector<16x128xf32>
    %39 = vector.extract_strided_slice %14 {offsets = [0, 4], sizes = [16, 1], strides = [1, 1]} : vector<16x8xi32> to vector<16x1xi32>
    %40 = vector.broadcast %39 : vector<16x1xi32> to vector<16x128xi32>
    %41 = arith.cmpi eq, %40, %13 : vector<16x128xi32>
    %cst_11 = arith.constant 0.000000e+00 : f32
    %42 = vector.broadcast %cst_11 : f32 to vector<16x128xf32>
    %43 = arith.select %41, %11, %42 : vector<16x128xi1>, vector<16x128xf32>
    %44 = arith.addf %38, %43 : vector<16x128xf32>
    %45 = vector.extract_strided_slice %14 {offsets = [0, 5], sizes = [16, 1], strides = [1, 1]} : vector<16x8xi32> to vector<16x1xi32>
    %46 = vector.broadcast %45 : vector<16x1xi32> to vector<16x128xi32>
    %47 = arith.cmpi eq, %46, %13 : vector<16x128xi32>
    %cst_12 = arith.constant 0.000000e+00 : f32
    %48 = vector.broadcast %cst_12 : f32 to vector<16x128xf32>
    %49 = arith.select %47, %11, %48 : vector<16x128xi1>, vector<16x128xf32>
    %50 = arith.addf %44, %49 : vector<16x128xf32>
    %51 = vector.extract_strided_slice %14 {offsets = [0, 6], sizes = [16, 1], strides = [1, 1]} : vector<16x8xi32> to vector<16x1xi32>
    %52 = vector.broadcast %51 : vector<16x1xi32> to vector<16x128xi32>
    %53 = arith.cmpi eq, %52, %13 : vector<16x128xi32>
    %cst_13 = arith.constant 0.000000e+00 : f32
    %54 = vector.broadcast %cst_13 : f32 to vector<16x128xf32>
    %55 = arith.select %53, %11, %54 : vector<16x128xi1>, vector<16x128xf32>
    %56 = arith.addf %50, %55 : vector<16x128xf32>
    %57 = vector.extract_strided_slice %14 {offsets = [0, 7], sizes = [16, 1], strides = [1, 1]} : vector<16x8xi32> to vector<16x1xi32>
    %58 = vector.broadcast %57 : vector<16x1xi32> to vector<16x128xi32>
    %59 = arith.cmpi eq, %58, %13 : vector<16x128xi32>
    %cst_14 = arith.constant 0.000000e+00 : f32
    %60 = vector.broadcast %cst_14 : f32 to vector<16x128xf32>
    %61 = arith.select %59, %11, %60 : vector<16x128xi1>, vector<16x128xf32>
    %62 = arith.addf %56, %61 : vector<16x128xf32>
    %63 = vector.shape_cast %62 : vector<16x128xf32> to vector<2x8x128xf32>
    %cst_15 = arith.constant dense<0.000000e+00> : vector<2x128xf32>
    %64 = vector.multi_reduction <add>, %63, %cst_15 [1] : vector<2x8x128xf32> to vector<2x128xf32>
    %c0_16 = arith.constant 0 : index
    %c0_17 = arith.constant 0 : index
    %65 = vector.load %arg2[%c0_16, %c0_17] : memref<134x128xf32, #tpu.memory_space<vmem>>, vector<128x128xf32>
    %cst_18 = arith.constant dense<0.000000e+00> : vector<2x128xf32>
    %66 = tpu.matmul %64, %65, %cst_18 {dimension_numbers = #tpu.dot_dimension_numbers<[1], [0], [0], [1], [0, 0, 1, 1], [], []>, precision = #tpu.contract_precision<fp32>} : vector<2x128xf32>, vector<128x128xf32>, vector<2x128xf32> -> vector<2x128xf32>
    %c0_19 = arith.constant 0 : index
    %c0_20 = arith.constant 0 : index
    %67 = vector.load %arg3[%c0_19, %c0_20] : memref<2x128xf32, #tpu.memory_space<vmem>>, vector<2x128xf32>
    tpu.vector_store %arg3[%c0_19, %c0_20], %66 {strides = array<i32>} : memref<2x128xf32, #tpu.memory_space<vmem>>, vector<2x128xf32>,
    return
  }
}

</mosaic_0001>

<bundles_post_ra>
// kernel: tpu_custom_call.1
= control target key start
LH: loop header
LB: loop body
LE: loop exit
PB: predicated region body
PF: predicated region fallthrough
CT: control target
= control target key end

     0   :  { %8 = vsyncpa [#allocation3], 0  ;;  %s2344_s0 = inlined_call_operand.vmem [shape: f32[16,7], index: 0, kind: input, shape index: {}]   ;;  %s2345_s1 = inlined_call_operand.vmem [shape: s32[16,8], index: 1, kind: input, shape index: {}]   ;;  %s2346_s2 = inlined_call_operand.hbm [shape: f32[134,128], index: 2, kind: input, shape index: {}]   ;;  %s2347_s3 = inlined_call_operand.hbm [shape: f32[2,128], index: 3, kind: output, shape index: {}]  }
   0x1   :  { %9 = vsyncpa [#allocation4], 0  ;;  %s1948_s12 = smov [#allocation2]   ;;  %s1900_s16 = scalar_lea.hbm %s2346_s2, 2176 }
   0x2   :  { %s19_s13 = sshll.u32 %s1948_s12, 4  ;;  %p1901_p0 = scmp.ne.s32.totalorder %s2346_s2, %s1900_s16  ;;  %s20_s13 = int_to_ptr.vmem [resolvable:$true] %s19_s13 }
   0x3   :  { %p1904_p1 = scmp.lt.u32.totalorder %s1900_s16, %s2346_s2 }
   0x5   :  { %p1906_p2 = pnand %p1904_p1, %p1901_p0 }
   0x7   :  { %1909 = shalt.err (!%p1906_p2)
}
   0x8   :  { %s1910_s21 = scalar_lea.vmem %s20_s13, 2176  ;;  %p1915_p4 = scmp.lt.s32.totalorder %s20_s13, %s20_s13 }
   0x9   :  { %p1911_p3 = scmp.ne.s32.totalorder %s20_s13, %s1910_s21  ;;  %p1916_p5 = scmp.lt.s32.totalorder %s1910_s21, %s1910_s21 }
   0xb   :  { %p1917_p6 = por %p1916_p5, %p1915_p4 }
   0xd   :  { %p1918_p7 = pnand %p1917_p6, %p1911_p3 }
   0xf   :  { %1921 = shalt.err (!%p1918_p7)
}
  0x10   :  { %s1949_s22 = smov 128   ;;  %s1950_s23 = smov 8  }
  0x11   :  { %25 = dma.hbm_to_vmem [thread:$0]  %s2346_s2, 2176, %s20_s13, [#allocation3], %s1949_s22, %s1949_s22, %s1950_s23  }
  0x12   :  { %1944 = dma.done.wait [#allocation3], 2176  }
  0x13   :  { %1945 = vsyncadd [#allocation3], 4294965120  ;;  %v1951_v0 = vmov 0   ;;  %v1952_v1 = vmov 6   ;;  %vm39_vm0 = vcmask 1045504   ;;  %vm32_vm1 = vcmask 48128  }
  0x14   :  { %1883 = vset.pattern.permute.xlu1 %v1951_v0  ;;  %1882 = vset.pattern.permute.xlu0 %v1952_v1  ;;  %v31_v2 = vld [vmem:[#allocation2 + $0x80] sm:$0x3f]  ;;  %v30_v4 = vld [vmem:[%s2344_s0 + $0x8] sm:$0xff]  ;;  %v1953_v25 = vmov 1   ;;  %v1954_v26 = vmov 2   ;;  %v1955_v27 = vmov 3  }
  0x15   :  { %v29_v3 = vld [vmem:[%s2344_s0] sm:$0xff]  ;;  %v41_v5 = vsel %vm39_vm0, %v31_v2, 0  ;;  %v37_v7 = vsel %vm32_vm1, %v30_v4, 0  ;;  %v2011_v12 = vld [vmem:[%s2345_s1 + $0x8] sm:$0xff]  ;;  %v1956_v28 = vmov 4   ;;  %v1957_v29 = vmov 5  }
  0x16   :  { %v34_v6 = vsel %vm32_vm1, %v29_v3, 0  ;;  %v2005_v8 = vld [vmem:[%s2345_s1] sm:$0xff]  ;;  %543 = vperm.xlu0 %1882, %v29_v3   ;;  %v44_v9 = vand.u32 4294901760, %v41_v5  ;;  %v119_v11 = vand.u32 4294901760, %v37_v7  ;;  %v1958_v30 = vmov 7   ;;  %v665_v32 = vld [vmem:[#allocation2 + $0x8] sm:$0xff] }
  0x17   :  { %v109_v10 = vand.u32 4294901760, %v34_v6  ;;  %557 = vperm.xlu1 %1883, %v2005_v8   ;;  %v664_v31 = vld [vmem:[#allocation2] sm:$0xff]  ;;  %v689_v34 = vand.u32 4294901760, %v665_v32  ;;  %v2348_v36 = vmov 0.0|0.0   ;;  %v666_v37 = vld [vmem:[#allocation2 + $0x10] sm:$0xff]  ;;  %v667_v38 = vld [vmem:[#allocation2 + $0x18] sm:$0xff] }
  0x18   :  { %1479 = vmatprep.subr.mxu0 %v44_v9  ;;  %v120_v14 = vsub.f32 %v37_v7, %v119_v11  ;;  %1464 = vmatprep.subr.mxu1 %v44_v9  ;;  %v131_v15 = vsub.f32 %v41_v5, %v44_v9  ;;  %v686_v33 = vand.u32 4294901760, %v664_v31  ;;  %v692_v39 = vand.u32 4294901760, %v666_v37  ;;  %v668_v42 = vld [vmem:[#allocation2 + $0x20] sm:$0xff]  ;;  %v669_v43 = vld [vmem:[#allocation2 + $0x28] sm:$0xff]  ;;  %v670_v47 = vld [vmem:[#allocation2 + $0x30] sm:$0xff]  ;;  %s1962_s0 = smov [#allocation5]  }
  0x19   :  { %v110_v13 = vsub.f32 %v34_v6, %v109_v10  ;;  %1480 = vmatpush3.msra.mxu0 %v44_v9  ;;  %1465 = vmatpush3.msra.mxu1 %v44_v9  ;;  %v695_v40 = vand.u32 4294901760, %v667_v38  ;;  %v698_v44 = vand.u32 4294901760, %v668_v42  ;;  %v701_v45 = vand.u32 4294901760, %v669_v43  ;;  %v671_v48 = vld [vmem:[#allocation2 + $0x38] sm:$0xff]  ;;  %v672_v52 = vld [vmem:[#allocation2 + $0x40] sm:$0xff]  ;;  %v673_v53 = vld [vmem:[#allocation2 + $0x48] sm:$0xff] }
  0x1a   :  { %v121_v17 = vand.u32 4294901760, %v120_v14  ;;  %v132_v18 = vand.u32 4294901760, %v131_v15  ;;  %547 = vperm.xlu0 %1882, %v30_v4   ;;  %v2029_v35 = vpack.c.bf16 %v689_v34, %v686_v33  ;;  %v704_v49 = vand.u32 4294901760, %v670_v47  ;;  %v674_v57 = vld [vmem:[#allocation2 + $0x50] sm:$0xff]  ;;  %v675_v58 = vld [vmem:[#allocation2 + $0x58] sm:$0xff]  ;;  %v676_v62 = vld [vmem:[#allocation2 + $0x60] sm:$0xff] }
  0x1b   :  { %v111_v16 = vand.u32 4294901760, %v110_v13  ;;  %560 = vperm.xlu1 %1883, %v2011_v12   ;;  %v2037_v41 = vpack.c.bf16 %v695_v40, %v692_v39  ;;  %v2043_v46 = vpack.c.bf16 %v701_v45, %v698_v44  ;;  %v707_v50 = vand.u32 4294901760, %v671_v48  ;;  %v677_v63 = vld [vmem:[#allocation2 + $0x68] sm:$0xff]  ;;  %s1333_s1 = sshll.u32 %s1962_s0, 4  ;;  %s1334_s1 = int_to_ptr.vmem [resolvable:$true] %s1333_s1 }
  0x1c   :  { %v133_v20 = vsub.f32 %v131_v15, %v132_v18  ;;  %1484 = vmatprep.subr.mxu0 %v132_v18  ;;  %v122_v21 = vsub.f32 %v120_v14, %v121_v17  ;;  %v710_v54 = vand.u32 4294901760, %v672_v52  ;;  %v713_v55 = vand.u32 4294901760, %v673_v53  ;;  %s1922_s6 = scalar_lea.vmem %s1334_s1, 32  ;;  %p1927_p9 = scmp.lt.s32.totalorder %s1334_s1, %s1334_s1 }
  0x1d   :  { %1481 = vmatprep.mubr.f32.mxu0 %v111_v16  ;;  %v112_v19 = vsub.f32 %v110_v13, %v111_v16  ;;  %v2049_v51 = vpack.c.bf16 %v707_v50, %v704_v49  ;;  %v716_v59 = vand.u32 4294901760, %v674_v57  ;;  %v719_v60 = vand.u32 4294901760, %v675_v58  ;;  %p1923_p8 = scmp.ne.s32.totalorder %s1334_s1, %s1922_s6  ;;  %p1928_p10 = scmp.lt.s32.totalorder %s1922_s6, %s1922_s6 }
  0x1e   :  { %1482 = vmatmul.mubr.f32.vlgmr.msra.gmra.mrb[0].mxu0 %v121_v17  ;;  %v134_v23 = vand.u32 4294901760, %v133_v20  ;;  %v123_v24 = vand.u32 4294901760, %v122_v21  ;;  %1884 = vset.pattern.permute.xlu0 %v1953_v25  ;;  %v2055_v56 = vpack.c.bf16 %v713_v55, %v710_v54  ;;  %v722_v0 = vand.u32 4294901760, %v676_v62 }
  0x1f   :  { %v113_v22 = vand.u32 4294901760, %v112_v19  ;;  %1485 = vmatpush3.msra.mxu0 %v132_v18  ;;  %1486 = vmatprep.mubr.f32.mxu0 %v109_v10  ;;  %v2061_v61 = vpack.c.bf16 %v719_v60, %v716_v59  ;;  %v2069_v3 = vsub.f32 %v664_v31, %v686_v33  ;;  %v2071_v4 = vsub.f32 %v665_v32, %v689_v34  ;;  %p1929_p11 = por %p1928_p10, %p1927_p9 }
  0x20   :  { %1489 = vmatprep.subr.mxu0 %v44_v9  ;;  %1885 = vset.pattern.permute.xlu1 %v1953_v25  ;;  %v2073_v5 = vsub.f32 %v666_v37, %v692_v39  ;;  %v2075_v6 = vsub.f32 %v667_v38, %v695_v40  ;;  %v2077_v7 = vsub.f32 %v668_v42, %v698_v44  ;;  %vm1960_vm2 = vmmov 0  }
  0x21   :  { %1466 = vmatprep.mubr.f32.mxu1 %v113_v22  ;;  %1469 = vmatprep.subr.mxu1 %v134_v23  ;;  %v2094_v16 = vsub.f32 %v675_v58, %v719_v60  ;;  %v2096_v17 = vsub.f32 %v676_v62, %v722_v0  ;;  %v779_v25 = vand.u32 4294901760, %v2069_v3  ;;  %p1930_p12 = pnand %p1929_p11, %p1923_p8 }
  0x22   :  { %1467 = vmatmul.mubr.f32.vlgmr.msra.gmra.mrb[0].mxu1 %v123_v24  ;;  %572 = vperm.xlu1 %1885, %v2011_v12   ;;  %v2350_v24 = vmov 0.0   ;;  %v800_v31 = vand.u32 4294901760, %v2075_v6 }
  0x23   :  { %1470 = vmatpush3.msra.mxu1 %v134_v23  ;;  %1471 = vmatprep.mubr.f32.mxu1 %v109_v10 }
  0x24   :  { %1474 = vmatprep.subr.mxu1 %v131_v15  ;;  %569 = vperm.xlu0 %1884, %v2005_v8   ;;  %v801_v38 = vsub.f32 %v2075_v6, %v800_v31 }
  0x26   :  { %1487 = vmatmul.mubr.f32.vlgmr.msra.gmra.mrb[0].mxu0 %v119_v11  ;;  %1886 = vset.pattern.permute.xlu1 %v1954_v26  ;;  %v802_v42 = vand.u32 4294901760, %v801_v38  ;;  %v863_v38 = vand.u32 4294901760, %v2096_v17 }
  0x27   :  { %1490 = vmatpush3.msra.mxu0 %v44_v9  ;;  %1491 = vmatprep.mubr.f32.mxu0 %v109_v10  ;;  %v678_v9 = vld [vmem:[#allocation2 + $0x70] sm:$0xff]  ;;  %v679_v10 = vld [vmem:[#allocation2 + $0x78] sm:$0xff] }
  0x28   :  { %581 = vperm.xlu1 %1886, %v2005_v8   ;;  %1887 = vset.pattern.permute.xlu0 %v1954_v26  ;;  %v728_v19 = vand.u32 4294901760, %v678_v9  ;;  %v731_v20 = vand.u32 4294901760, %v679_v10  ;;  %v786_v26 = vand.u32 4294901760, %v2071_v4 }
  0x29   :  { %584 = vperm.xlu0 %1887, %v2011_v12   ;;  %1704 = vmatprep.subr.bf16.mxu0 %v2348_v36 }
  0x2a   :  { %1472 = vmatmul.mubr.f32.vlgmr.msra.gmra.mrb[0].mxu1 %v119_v11  ;;  %v2101_v21 = vpack.c.bf16 %v731_v20, %v728_v19  ;;  %v2103_v22 = vsub.f32 %v678_v9, %v728_v19  ;;  %v2105_v23 = vsub.f32 %v679_v10, %v731_v20 }
  0x2b   :  { %1475 = vmatpush3.msra.mxu1 %v131_v15  ;;  %1476 = vmatprep.mubr.f32.mxu1 %v110_v13  ;;  %v2086_v13 = vsub.f32 %v672_v52, %v710_v54  ;;  %v2092_v15 = vsub.f32 %v674_v57, %v716_v59 }
  0x2c   :  { %1888 = vset.pattern.permute.xlu1 %v1955_v27  ;;  %1776 = vmatprep.subr.bf16.mxu1 %v2348_v36  ;;  %2354 = vst [vmem:[#allocation8_spill] sm:$0xff] %v2103_v22  ;;  %2355 = vst [vmem:[#allocation9_spill] sm:$0xff] %v2105_v23  ;;  %v2116_v27 = vpack.c.bf16 %v786_v26, %v779_v25 }
  0x2d   :  { %593 = vperm.xlu1 %1888, %v2005_v8   ;;  %1889 = vset.pattern.permute.xlu0 %v1956_v28 }
  0x2e   :  { %1492 = vmatmul.mubr.f32.vlgmr.msra.gmra.mrb[0].mxu0 %v119_v11  ;;  %605 = vperm.xlu0 %1889, %v2005_v8   ;;  %v2082_v11 = vsub.f32 %v670_v47, %v704_v49 }
  0x2f   :  { %1706 = vmatpush3.bf16.msra.mxu0 %v2029_v35  ;;  %1526 = vmatprep.mubr.msk.f32.mxu0 %vm1960_vm2, %v2350_v24 }
  0x30   :  { %1707 = vmatprep.subr.bf16.mxu0 %v2348_v36  ;;  %v821_v52 = vand.u32 4294901760, %v2082_v11 }
  0x31   :  { %596 = vperm.xlu1 %1888, %v2011_v12  }
  0x32   :  { %1477 = vmatmul.mubr.f32.vlgmr.msra.gmra.mrb[0].mxu1 %v120_v14  ;;  %1892 = vset.pattern.permute.xlu0 %v1957_v29  ;;  %v2090_v14 = vsub.f32 %v673_v53, %v713_v55  ;;  %v822_v57 = vsub.f32 %v2082_v11, %v821_v52 }
  0x33   :  { %620 = vperm.xlu0 %1892, %v2011_v12   ;;  %1778 = vmatpush3.bf16.msra.mxu1 %v2029_v35 }
  0x34   :  { %1779 = vmatprep.subr.bf16.mxu1 %v2348_v36  ;;  %1709 = vmatpush3.bf16.msra.mxu0 %v2037_v41  ;;  %v823_v60 = vand.u32 4294901760, %v822_v57 }
  0x35   :  { %1890 = vset.pattern.permute.xlu1 %v1956_v28  ;;  %1710 = vmatprep.subr.bf16.mxu0 %v2348_v36  ;;  %v780_v28 = vsub.f32 %v2069_v3, %v779_v25 }
  0x36   :  { %608 = vperm.xlu1 %1890, %v2011_v12   ;;  %1631 = vmatprep.mubr.msk.f32.mxu1 %vm1960_vm2, %v2350_v24 }
  0x37   :  { %1894 = vset.pattern.permute.xlu0 %v1958_v30  ;;  %1781 = vmatpush3.bf16.msra.mxu1 %v2037_v41  ;;  %v781_v32 = vand.u32 4294901760, %v780_v28  ;;  %v856_v28 = vand.u32 4294901760, %v2094_v16 }
  0x38   :  { %641 = vperm.xlu0 %1894, %v2005_v8   ;;  %1782 = vmatprep.subr.bf16.mxu1 %v2348_v36 }
  0x39   :  { %1712 = vmatpush3.bf16.msra.mxu0 %v2043_v46 }
  0x3a   :  { %1891 = vset.pattern.permute.xlu1 %v1957_v29  ;;  %1713 = vmatprep.subr.bf16.mxu0 %v2348_v36  ;;  %v787_v29 = vsub.f32 %v2071_v4, %v786_v26  ;;  %v849_v26 = vand.u32 4294901760, %v2092_v15 }
  0x3b   :  { %617 = vperm.xlu1 %1891, %v2005_v8   ;;  %1784 = vmatpush3.bf16.msra.mxu1 %v2043_v46 }
  0x3c   :  { %1785 = vmatprep.subr.bf16.mxu1 %v2348_v36  ;;  %v788_v33 = vand.u32 4294901760, %v787_v29 }
  0x3d   :  { %1715 = vmatpush3.bf16.msra.mxu0 %v2049_v51 }
  0x3e   :  { %1716 = vmatprep.subr.bf16.mxu0 %v2348_v36  ;;  %v2127_v39 = vpack.c.bf16 %v788_v33, %v781_v32  ;;  %v857_v32 = vsub.f32 %v2094_v16, %v856_v28 }
  0x3f   :  { %1893 = vset.pattern.permute.xlu1 %v1952_v1  ;;  %1787 = vmatpush3.bf16.msra.mxu1 %v2049_v51  ;;  %v725_v1 = vand.u32 4294901760, %v677_v63 }
  0x40   :  { %629 = vperm.xlu1 %1893, %v2005_v8   ;;  %1788 = vmatprep.subr.bf16.mxu1 %v2348_v36  ;;  %v2079_v8 = vsub.f32 %v669_v43, %v701_v45  ;;  %v807_v43 = vand.u32 4294901760, %v2077_v7 }
  0x41   :  { %1718 = vmatpush3.bf16.msra.mxu0 %v2055_v56  ;;  %v2067_v2 = vpack.c.bf16 %v725_v1, %v722_v0  ;;  %v2099_v18 = vsub.f32 %v677_v63, %v725_v1  ;;  %v835_v63 = vand.u32 4294901760, %v2086_v13  ;;  %v842_v0 = vand.u32 4294901760, %v2090_v14 }
  0x42   :  { %1719 = vmatprep.subr.bf16.mxu0 %v2348_v36  ;;  %v814_v44 = vand.u32 4294901760, %v2079_v8 }
  0x43   :  { %1790 = vmatpush3.bf16.msra.mxu1 %v2055_v56  ;;  %v2149_v9 = vpack.c.bf16 %v842_v0, %v835_v63  ;;  %v836_v10 = vsub.f32 %v2086_v13, %v835_v63  ;;  %v843_v19 = vsub.f32 %v2090_v14, %v842_v0 }
  0x44   :  { %632 = vperm.xlu1 %1893, %v2011_v12   ;;  %1791 = vmatprep.subr.bf16.mxu1 %v2348_v36  ;;  %v2133_v47 = vpack.c.bf16 %v814_v44, %v807_v43  ;;  %v815_v49 = vsub.f32 %v2079_v8, %v814_v44  ;;  %v864_v44 = vsub.f32 %v2096_v17, %v863_v38 }
  0x45   :  { %1721 = vmatpush3.bf16.msra.mxu0 %v2061_v61  ;;  %v837_v20 = vand.u32 4294901760, %v836_v10  ;;  %v844_v25 = vand.u32 4294901760, %v843_v19 }
  0x46   :  { %1722 = vmatprep.subr.bf16.mxu0 %v2348_v36  ;;  %v816_v54 = vand.u32 4294901760, %v815_v49  ;;  %v865_v49 = vand.u32 4294901760, %v864_v44 }
  0x47   :  { %1793 = vmatpush3.bf16.msra.mxu1 %v2061_v61  ;;  %v2155_v29 = vpack.c.bf16 %v844_v25, %v837_v20 }
  0x48   :  { %1895 = vset.pattern.permute.xlu1 %v1958_v30  ;;  %1794 = vmatprep.subr.bf16.mxu1 %v2348_v36  ;;  %v793_v30 = vand.u32 4294901760, %v2073_v5 }
  0x49   :  { %644 = vperm.xlu1 %1895, %v2011_v12   ;;  %v2084_v12 = vsub.f32 %v671_v48, %v707_v50  ;;  %1724 = vmatpush3.bf16.msra.mxu0 %v2067_v2  ;;  %v808_v48 = vsub.f32 %v2077_v7, %v807_v43 }
  0x4a   :  { %1725 = vmatprep.subr.bf16.mxu0 %v2348_v36  ;;  %v2123_v34 = vpack.c.bf16 %v800_v31, %v793_v30  ;;  %v794_v37 = vsub.f32 %v2073_v5, %v793_v30  ;;  %v2157_v30 = vpack.c.bf16 %v856_v28, %v849_v26  ;;  %v850_v31 = vsub.f32 %v2092_v15, %v849_v26 }
  0x4b   :  { %1796 = vmatpush3.bf16.msra.mxu1 %v2067_v2  ;;  %v809_v50 = vand.u32 4294901760, %v808_v48  ;;  %v828_v53 = vand.u32 4294901760, %v2084_v12 }
  0x4c   :  { %1797 = vmatprep.subr.bf16.mxu1 %v2348_v36  ;;  %v795_v40 = vand.u32 4294901760, %v794_v37  ;;  %v851_v33 = vand.u32 4294901760, %v850_v31  ;;  %v858_v37 = vand.u32 4294901760, %v857_v32 }
  0x4d   :  { %1727 = vmatpush3.bf16.msra.mxu0 %v2101_v21  ;;  %v2139_v55 = vpack.c.bf16 %v828_v53, %v821_v52  ;;  %v829_v58 = vsub.f32 %v2084_v12, %v828_v53  ;;  %v2143_v59 = vpack.c.bf16 %v816_v54, %v809_v50  ;;  %v877_v52 = vand.u32 4294901760, %v2103_v22 }
  0x4e   :  { %1728 = vmatprep.subr.bf16.mxu0 %v2348_v36  ;;  %v2131_v45 = vpack.c.bf16 %v802_v42, %v795_v40  ;;  %v870_v40 = vand.u32 4294901760, %v2099_v18  ;;  %v2163_v42 = vpack.c.bf16 %v858_v37, %v851_v33  ;;  %v884_v53 = vand.u32 4294901760, %v2105_v23 }
  0x4f   :  { %1799 = vmatpush3.bf16.msra.mxu1 %v2101_v21  ;;  %v830_v62 = vand.u32 4294901760, %v829_v58  ;;  %v878_v58 = vsub.f32 %v2103_v22, %v877_v52 }
  0x50   :  { %1800 = vmatprep.subr.bf16.mxu1 %v2348_v36  ;;  %v2165_v43 = vpack.c.bf16 %v870_v40, %v863_v38  ;;  %v871_v48 = vsub.f32 %v2099_v18, %v870_v40  ;;  %v2173_v57 = vpack.c.bf16 %v884_v53, %v877_v52  ;;  %v552_v38 = vlaneseq }
  0x51   :  { %v2147_v1 = vpack.c.bf16 %v830_v62, %v823_v60  ;;  %v885_v60 = vsub.f32 %v2105_v23, %v884_v53  ;;  %v879_v62 = vand.u32 4294901760, %v878_v58 }
  0x52   :  { %v872_v50 = vand.u32 4294901760, %v871_v48  ;;  %v2199_v10 = vand.u32 127, %v552_v38 }
  0x53   :  { %v886_v63 = vand.u32 4294901760, %v885_v60 }
  0x54   :  { %v2171_v54 = vpack.c.bf16 %v872_v50, %v865_v49 }
  0x55   :  { %v2177_v0 = vpack.c.bf16 %v886_v63, %v879_v62 }
  0x95   :  { %v2195_v48 = vpop.permute.xlu0 %543 }
  0x96   :  { %v558_v20 = vpop.permute.xlu1 %557 }
  0x97   :  { %vm562_vm5 = vcmp.eq.s32.totalorder %v558_v20, %v2199_v10 }
  0x99   :  { %v2197_v53 = vpop.permute.xlu0 %547 }
  0x9a   :  { %v561_v26 = vpop.permute.xlu1 %560 }
  0x9b   :  { %vm563_vm3 = vcmp.eq.s32.totalorder %v561_v26, %v2199_v10 }
  0x9c   :  { %v565_v38 = vsel %vm563_vm3, %v2197_v53, 0.0 }
  0xa1   :  { %v573_v32 = vpop.permute.xlu1 %572 }
  0xa2   :  { %vm575_vm7 = vcmp.eq.s32.totalorder %v573_v32, %v2199_v10 }
  0xa3   :  { %v570_v25 = vpop.permute.xlu0 %569  ;;  %v577_v20 = vsel %vm575_vm7, %v2197_v53, 0.0 }
  0xa4   :  { %vm574_vm8 = vcmp.eq.s32.totalorder %v570_v25, %v2199_v10 }
  0xa7   :  { %v582_v37 = vpop.permute.xlu1 %581 }
  0xa8   :  { %v585_v44 = vpop.permute.xlu0 %584  ;;  %vm586_vm10 = vcmp.eq.s32.totalorder %v582_v37, %v2199_v10 }
  0xa9   :  { %vm587_vm9 = vcmp.eq.s32.totalorder %v585_v44, %v2199_v10  ;;  %v588_v37 = vsel %vm586_vm10, %v2195_v48, 0.0 }
  0xac   :  { %v594_v40 = vpop.permute.xlu1 %593 }
  0xad   :  { %vm598_vm12 = vcmp.eq.s32.totalorder %v594_v40, %v2199_v10 }
  0xb0   :  { %v597_v52 = vpop.permute.xlu1 %596 }
  0xb1   :  { %vm599_vm11 = vcmp.eq.s32.totalorder %v597_v52, %v2199_v10 }
  0xb5   :  { %v609_v31 = vpop.permute.xlu1 %608 }
  0xb6   :  { %vm611_vm13 = vcmp.eq.s32.totalorder %v609_v31, %v2199_v10 }
  0xb7   :  { %v613_v40 = vsel %vm611_vm13, %v2197_v53, 0.0 }
  0xba   :  { %v618_v19 = vpop.permute.xlu1 %617 }
  0xbb   :  { %vm622_vm0 = vcmp.eq.s32.totalorder %v618_v19, %v2199_v10 }
  0xbf   :  { %v630_v22 = vpop.permute.xlu1 %629 }
  0xc0   :  { %vm634_vm3 = vcmp.eq.s32.totalorder %v630_v22, %v2199_v10 }
 0x101   :  { %v1493_v49 = vpop.f32.mrb[0].mxu0 }
 0x102   :  { %v522_v50 = vpop.f32.mrb[1].mxu0 }
 0x105   :  { %v1478_v58 = vpop.f32.mrb[0].mxu1 }
 0x106   :  { %v1848_v60 = vadd.f32 %v1493_v49, %v1478_v58  ;;  %v281_v62 = vpop.f32.mrb[1].mxu1  ;;  %v606_v49 = vpop.permute.xlu0 %605 }
 0x107   :  { %v1849_v63 = vadd.f32 %v522_v50, %v281_v62  ;;  %vm610_vm14 = vcmp.eq.s32.totalorder %v606_v49, %v2199_v10 }
 0x108   :  { %v536_v33 = vmul.f32 1.442695, %v1848_v60  ;;  %vm533_vm4 = vcmp.gt.f32.partialorder %v1848_v60, 0.0  ;;  %v612_v31 = vsel %vm610_vm14, %v2195_v48, 0.0 }
 0x109   :  { %v534_v28 = vmul.f32 1.442695, %v1849_v63  ;;  %vm532_vm6 = vcmp.gt.f32.partialorder %v1849_v63, 0.0 }
 0x10a   :  { %1896 = vpow2.f32 %v536_v33  ;;  %v621_v25 = vpop.permute.xlu0 %620 }
 0x10b   :  { %1898 = vpow2.f32 %v534_v28  ;;  %vm623_vm15 = vcmp.eq.s32.totalorder %v621_v25, %v2199_v10 }
 0x10e   :  { %v642_v49 = vpop.permute.xlu0 %641 }
 0x114   :  { %v1897_v36 = vpop.eup %1896 }
 0x115   :  { %v1899_v24 = vpop.eup %1898  ;;  %v1343_v23 = vadd.f32 -1.0, %v1897_v36 }
 0x116   :  { %v1342_v50 = vadd.f32 -1.0, %v1899_v24  ;;  %v564_v24 = vsel %vm562_vm5, %v2195_v48, 0.0  ;;  %vm646_vm5 = vcmp.eq.s32.totalorder %v642_v49, %v2199_v10 }
 0x117   :  { %v541_v58 = vsel %vm533_vm4, %v1848_v60, %v1343_v23  ;;  %v633_v23 = vpop.permute.xlu1 %632  ;;  %v576_v60 = vsel %vm574_vm8, %v2195_v48, 0.0 }
 0x118   :  { %v551_v28 = vmul.f32 %v2197_v53, %v541_v58  ;;  %v540_v33 = vsel %vm532_vm6, %v1849_v63, %v1342_v50  ;;  %v589_v63 = vsel %vm587_vm9, %v2197_v53, 0.0  ;;  %vm635_vm1 = vcmp.eq.s32.totalorder %v633_v23, %v2199_v10 }
 0x119   :  { %v550_v36 = vmul.f32 %v2195_v48, %v540_v33  ;;  %v600_v33 = vsel %vm598_vm12, %v2195_v48, 0.0  ;;  %v637_v19 = vsel %vm635_vm1, %v2197_v53, 0.0  ;;  %vm682_vm6 = vcmask 1041409  }
 0x11a   :  { %v567_v26 = vadd.f32 %v565_v38, %v551_v28  ;;  %v601_v28 = vsel %vm599_vm11, %v2197_v53, 0.0 }
 0x11b   :  { %v566_v32 = vadd.f32 %v564_v24, %v550_v36  ;;  %v645_v38 = vpop.permute.xlu1 %644  ;;  %v625_v24 = vsel %vm623_vm15, %v2197_v53, 0.0 }
 0x11c   :  { %v579_v62 = vadd.f32 %v577_v20, %v567_v26  ;;  %vm647_vm4 = vcmp.eq.s32.totalorder %v645_v38, %v2199_v10 }
 0x11d   :  { %v578_v44 = vadd.f32 %v576_v60, %v566_v32  ;;  %v624_v32 = vsel %vm622_vm0, %v2195_v48, 0.0 }
 0x11e   :  { %v591_v50 = vadd.f32 %v589_v63, %v579_v62  ;;  %v636_v62 = vsel %vm634_vm3, %v2195_v48, 0.0  ;;  %v649_v63 = vsel %vm647_vm4, %v2197_v53, 0.0 }
 0x11f   :  { %v590_v58 = vadd.f32 %v588_v37, %v578_v44 }
 0x120   :  { %v603_v52 = vadd.f32 %v601_v28, %v591_v50  ;;  %v648_v50 = vsel %vm646_vm5, %v2195_v48, 0.0 }
 0x121   :  { %v602_v36 = vadd.f32 %v600_v33, %v590_v58 }
 0x122   :  { %v615_v26 = vadd.f32 %v613_v40, %v603_v52 }
 0x123   :  { %v614_v20 = vadd.f32 %v612_v31, %v602_v36 }
 0x124   :  { %v627_v60 = vadd.f32 %v625_v24, %v615_v26 }
 0x125   :  { %v626_v25 = vadd.f32 %v624_v32, %v614_v20 }
 0x126   :  { %v639_v23 = vadd.f32 %v637_v19, %v627_v60  ;;  %v2356_v19 = vmov 0.0  }
 0x127   :  { %v638_v44 = vadd.f32 %v636_v62, %v626_v25  ;;  %v2357_v25 = vmov 0.0|0.0  }
 0x128   :  { %v651_v22 = vadd.f32 %v649_v63, %v639_v23 }
 0x129   :  { %v650_v37 = vadd.f32 %v648_v50, %v638_v44 }
 0x12a   :  { %v658_v58 = vrot.slane %v651_v22, 4 }
 0x12b   :  { %v652_v28 = vrot.slane %v650_v37, 4 }
 0x12c   :  { %v659_v52 = vadd.f32 %v658_v58, %v651_v22 }
 0x12d   :  { %v653_v33 = vadd.f32 %v652_v28, %v650_v37 }
 0x12e   :  { %v660_v40 = vrot.slane %v659_v52, 2 }
 0x12f   :  { %v654_v38 = vrot.slane %v653_v33, 2 }
 0x130   :  { %v661_v36 = vadd.f32 %v660_v40, %v659_v52 }
 0x131   :  { %v655_v31 = vadd.f32 %v654_v38, %v653_v33 }
 0x132   :  { %v662_v26 = vrot.slane %v661_v36, 1 }
 0x133   :  { %v656_v10 = vrot.slane %v655_v31, 1 }
 0x134   :  { %v663_v49 = vadd.f32 %v662_v26, %v661_v36 }
 0x135   :  { %v657_v24 = vadd.f32 %v656_v10, %v655_v31 }
 0x137   :  { %v683_v20 = vsel %vm682_vm6, %v663_v49, %v657_v24 }
 0x138   :  { %v2235_v53 = vand.u32 4294901760, %v683_v20 }
 0x13a   :  { %v2238_v32 = vsub.f32 %v683_v20, %v2235_v53 }
 0x13c   :  { %v768_v48 = vand.u32 4294901760, %v2238_v32 }
 0x13e   :  { %1632 = vmatmul.mubr.f32.vlgmr.msra.gmra.mrb[2].mxu1 %v768_v48  ;;  %v769_v60 = vsub.f32 %v2238_v32, %v768_v48 }
 0x13f   :  { %1802 = vmatpush3.bf16.msra.mxu1 %v2116_v27  ;;  %1666 = vmatprep.mubr.msk.f32.mxu1 %vm1960_vm2, %v2356_v19  ;;  %v2358_v27 = vpack.c.bf16 %v2071_v4, %v2069_v3  ;;  %v2361_v3 = vpack.c.bf16 %v2084_v12, %v2082_v11  ;;  %v2366_v4 = vld [vmem:[#allocation8_spill] sm:$0xff] }
 0x140   :  { %1803 = vmatprep.subr.bf16.mxu1 %v2357_v25  ;;  %v770_v62 = vand.u32 4294901760, %v769_v60 }
 0x142   :  { %1527 = vmatmul.mubr.f32.vlgmr.msra.gmra.mrb[2].mxu0 %v770_v62 }
 0x143   :  { %1730 = vmatpush3.bf16.msra.mxu0 %v2127_v39  ;;  %1805 = vmatpush3.bf16.msra.mxu1 %v2123_v34 }
 0x144   :  { %1731 = vmatprep.subr.bf16.mxu0 %v2357_v25  ;;  %1806 = vmatprep.subr.bf16.mxu1 %v2357_v25 }
 0x145   :  { %1561 = vmatprep.mubr.msk.f32.mxu0 %vm1960_vm2, %v2356_v19 }
 0x147   :  { %1733 = vmatpush3.bf16.msra.mxu0 %v2131_v45  ;;  %1808 = vmatpush3.bf16.msra.mxu1 %v2133_v47 }
 0x148   :  { %1734 = vmatprep.subr.bf16.mxu0 %v2357_v25  ;;  %1809 = vmatprep.subr.bf16.mxu1 %v2357_v25 }
 0x14b   :  { %1736 = vmatpush3.bf16.msra.mxu0 %v2143_v59  ;;  %1811 = vmatpush3.bf16.msra.mxu1 %v2139_v55 }
 0x14c   :  { %1737 = vmatprep.subr.bf16.mxu0 %v2357_v25  ;;  %1812 = vmatprep.subr.bf16.mxu1 %v2357_v25 }
 0x14f   :  { %1739 = vmatpush3.bf16.msra.mxu0 %v2147_v1  ;;  %1814 = vmatpush3.bf16.msra.mxu1 %v2149_v9 }
 0x150   :  { %1740 = vmatprep.subr.bf16.mxu0 %v2357_v25  ;;  %1815 = vmatprep.subr.bf16.mxu1 %v2357_v25 }
 0x153   :  { %1742 = vmatpush3.bf16.msra.mxu0 %v2155_v29  ;;  %1817 = vmatpush3.bf16.msra.mxu1 %v2157_v30 }
 0x154   :  { %1743 = vmatprep.subr.bf16.mxu0 %v2357_v25  ;;  %1818 = vmatprep.subr.bf16.mxu1 %v2357_v25 }
 0x157   :  { %1745 = vmatpush3.bf16.msra.mxu0 %v2163_v42  ;;  %1820 = vmatpush3.bf16.msra.mxu1 %v2165_v43 }
 0x158   :  { %1746 = vmatprep.subr.bf16.mxu0 %v2357_v25  ;;  %1821 = vmatprep.subr.bf16.mxu1 %v2357_v25 }
 0x15b   :  { %1748 = vmatpush3.bf16.msra.mxu0 %v2171_v54  ;;  %1823 = vmatpush3.bf16.msra.mxu1 %v2173_v57 }
 0x15c   :  { %1749 = vmatprep.subr.bf16.mxu0 %v2357_v25  ;;  %1824 = vmatprep.subr.bf16.mxu1 %v2357_v25 }
 0x15e   :  { %1667 = vmatmul.mubr.f32.vlgmr.msra.gmra.mrb[2].mxu1 %v2235_v53 }
 0x15f   :  { %1751 = vmatpush3.bf16.msra.mxu0 %v2177_v0  ;;  %1826 = vmatpush3.bf16.msra.mxu1 %v2029_v35  ;;  %v2359_v35 = vpack.c.bf16 %v2075_v6, %v2073_v5 }
 0x160   :  { %1752 = vmatprep.subr.bf16.mxu0 %v2357_v25  ;;  %1827 = vmatprep.subr.bf16.mxu1 %v2357_v25 }
 0x161   :  { %1701 = vmatprep.mubr.msk.f32.mxu1 %vm1960_vm2, %v2356_v19 }
 0x162   :  { %1562 = vmatmul.mubr.f32.vlgmr.msra.gmra.mrb[2].mxu0 %v2235_v53 }
 0x163   :  { %1754 = vmatpush3.bf16.msra.mxu0 %v2358_v27  ;;  %1829 = vmatpush3.bf16.msra.mxu1 %v2037_v41  ;;  %v2360_v41 = vpack.c.bf16 %v2079_v8, %v2077_v7 }
 0x164   :  { %1755 = vmatprep.subr.bf16.mxu0 %v2357_v25  ;;  %1830 = vmatprep.subr.bf16.mxu1 %v2357_v25 }
 0x165   :  { %1596 = vmatprep.mubr.msk.f32.mxu0 %vm1960_vm2, %v2356_v19 }
 0x167   :  { %1757 = vmatpush3.bf16.msra.mxu0 %v2359_v35  ;;  %1832 = vmatpush3.bf16.msra.mxu1 %v2043_v46  ;;  %v2362_v46 = vpack.c.bf16 %v2090_v14, %v2086_v13 }
 0x168   :  { %1758 = vmatprep.subr.bf16.mxu0 %v2357_v25  ;;  %1833 = vmatprep.subr.bf16.mxu1 %v2357_v25 }
 0x16b   :  { %1760 = vmatpush3.bf16.msra.mxu0 %v2360_v41  ;;  %1835 = vmatpush3.bf16.msra.mxu1 %v2049_v51  ;;  %v2363_v51 = vpack.c.bf16 %v2094_v16, %v2092_v15 }
 0x16c   :  { %1761 = vmatprep.subr.bf16.mxu0 %v2357_v25  ;;  %1836 = vmatprep.subr.bf16.mxu1 %v2357_v25 }
 0x16f   :  { %1763 = vmatpush3.bf16.msra.mxu0 %v2361_v3  ;;  %1838 = vmatpush3.bf16.msra.mxu1 %v2055_v56  ;;  %v2364_v56 = vpack.c.bf16 %v2099_v18, %v2096_v17 }
 0x170   :  { %1764 = vmatprep.subr.bf16.mxu0 %v2357_v25  ;;  %1839 = vmatprep.subr.bf16.mxu1 %v2357_v25 }
 0x173   :  { %1766 = vmatpush3.bf16.msra.mxu0 %v2362_v46  ;;  %1841 = vmatpush3.bf16.msra.mxu1 %v2061_v61  ;;  %v2365_v61 = vld [vmem:[#allocation9_spill] sm:$0xff] }
 0x174   :  { %1767 = vmatprep.subr.bf16.mxu0 %v2357_v25  ;;  %1842 = vmatprep.subr.bf16.mxu1 %v2357_v25  ;;  %v2367_v5 = vpack.c.bf16 %v2365_v61, %v2366_v4 }
 0x177   :  { %1769 = vmatpush3.bf16.msra.mxu0 %v2363_v51  ;;  %1844 = vmatpush3.bf16.msra.mxu1 %v2067_v2 }
 0x178   :  { %1770 = vmatprep.subr.bf16.mxu0 %v2357_v25  ;;  %1845 = vmatprep.subr.bf16.mxu1 %v2357_v25 }
 0x17b   :  { %1772 = vmatpush3.bf16.msra.mxu0 %v2364_v56  ;;  %1847 = vmatpush3.bf16.msra.mxu1 %v2101_v21 }
 0x17c   :  { %1773 = vmatprep.subr.bf16.mxu0 %v2357_v25 }
 0x17e   :  { %1702 = vmatmul.mubr.f32.vlgmr.msra.gmra.mrb[2].mxu1 %v2235_v53 }
 0x17f   :  { %1775 = vmatpush3.bf16.msra.mxu0 %v2367_v5 }
 0x182   :  { %1597 = vmatmul.mubr.f32.vlgmr.msra.gmra.mrb[2].mxu0 %v2238_v32 }
 0x251   :  { %v1322_v2 = vpop.f32.mrb[2].mxu1 }
 0x252   :  { %v1703_v6 = vpop.f32.mrb[3].mxu1 }
 0x255   :  { %v1027_v7 = vpop.f32.mrb[2].mxu0 }
 0x256   :  { %v1850_v8 = vadd.f32 %v1322_v2, %v1027_v7  ;;  %v1598_v11 = vpop.f32.mrb[3].mxu0 }
 0x258   :  { %1326 = vst [vmem:[#allocation5] sm:$0x3] %v1850_v8 }
 0x259   :  { %1933 = shalt.err (!%p1930_p12)
}
 0x25a   :  { %s1934_s9 = scalar_lea.hbm %s2347_s3, 32 }
 0x25b   :  { %p1935_p13 = scmp.ne.s32.totalorder %s2347_s3, %s1934_s9  ;;  %p1938_p0 = scmp.lt.u32.totalorder %s1934_s9, %s2347_s3 }
 0x25d   :  { %p1940_p1 = pnand %p1938_p0, %p1935_p13 }
 0x25f   :  { %1943 = shalt.err (!%p1940_p1)
}
 0x260   :  { %1336 = dma.vmem_to_hbm [thread:$0]  %s1334_s1, 32, %s2347_s3, [#allocation4]  }
 0x261   :  { %1946 = dma.done.wait [#allocation4], 32  }
 0x262   :  { %1947 = vsyncadd [#allocation4], 4294967264 }
 0x263   :  { %1340 = vsyncpa [#allocation3], 1 }
 0x264   :  { %1341 = vsyncpa [#allocation4], 1 }

</bundles_post_ra>
